<compile_context>
chip_gen: v5e
topology: v5e:2x2
jax: 0.10.0
libtpu: 0.0.40
codegen_flags: <defaults>
</compile_context>

<pallas_src>
import jax
import jax.numpy as jnp
from jax.experimental import pallas as pl
from jax.experimental.pallas import tpu as pltpu


def _round_up(n, m):
    return ((n + m - 1) // m) * m


def _cdiv(a, b):
    return (a + b - 1) // b


def _is_v7x():
    try:
        kind = jax.local_devices()[0].device_kind.lower()
        return "v7" in kind
    except Exception:
        return False


def qtn_kernel(x_ref,
               w1_ref, w2_ref, w3_ref, w4_ref,
               b123_ref, b4_ref,
               o_ref):
    mm = w1_ref.dtype                       # matmul operand dtype (bf16 or f32)
    x = x_ref[...].astype(mm)               # no-op when wrapper already cast x

    # fc1 + ReLU   (MXU matmul, f32 accumulate; bias/ReLU in f32 on the VPU)
    h = jnp.dot(x, w1_ref[...], preferred_element_type=jnp.float32)
    h = jnp.maximum(h + b123_ref[0:1, :], 0.0)

    # tensor_network: Linear -> ReLU -> Linear
    h = jnp.dot(h.astype(mm), w2_ref[...], preferred_element_type=jnp.float32)
    h = jnp.maximum(h + b123_ref[1:2, :], 0.0)
    h = jnp.dot(h.astype(mm), w3_ref[...],
                preferred_element_type=jnp.float32) + b123_ref[2:3, :]

    # fc2 (no activation)
    out = jnp.dot(h.astype(mm), w4_ref[...],
                  preferred_element_type=jnp.float32) + b4_ref[...]
    o_ref[...] = out.astype(o_ref.dtype)


def _pad2(a, rows, cols, dtype):
    """Pad/cast to (rows, cols, dtype); returns the input untouched if already there."""
    a = jnp.asarray(a)
    if a.dtype != dtype:
        a = a.astype(dtype)
    pr, pc = rows - a.shape[0], cols - a.shape[1]
    if pr or pc:
        a = jnp.pad(a, ((0, pr), (0, pc)))
    return a


def _pack_bias_rows(biases, cols):
    rows = []
    for b in biases:
        b = jnp.asarray(b, jnp.float32).reshape(1, -1)
        if b.shape[1] != cols:
            b = jnp.pad(b, ((0, 0), (0, cols - b.shape[1])))
        rows.append(b)
    return jnp.concatenate(rows, axis=0)


def qtn_forward(x, params, *, matmul_dtype=jnp.bfloat16, max_tb=None,
                out_dtype=None):
    """x: (B, input_dim) f32. params: pre-transposed weights (in, out), biases (1, out).

    matmul_dtype: MXU operand dtype (bf16 default; f32 for strict accuracy).
    max_tb:       optional cap on the batch tile (default: sized from VMEM budget).
    out_dtype:    output dtype (default x.dtype; bf16 halves writeback on v5e).
    """
    B, in_dim = x.shape
    hid = params["w1"].shape[1]
    out_dim = params["w4"].shape[1]
    out_dtype = x.dtype if out_dtype is None else out_dtype

    # ---- lane-dense padding: every feature dim -> multiple of 128 ----------
    in_p = _round_up(in_dim, 128)
    hid_p = _round_up(hid, 128)
    out_p = _round_up(out_dim, 128)

    mm_item = jnp.dtype(matmul_dtype).itemsize
    out_item = jnp.dtype(out_dtype).itemsize
    sub = 16 if mm_item < 4 else 8          # sublane tile of the streamed x block

    # ---- batch tile from a per-chip VMEM budget ----------------------------
    v7x = _is_v7x()
    cap_bytes = (56 << 20) if v7x else (100 << 20)
    weight_bytes = (in_p * hid_p + 2 * hid_p * hid_p + hid_p * out_p) * mm_item
    bias_bytes = (3 * hid_p + out_p) * 4
    resident_bytes = 2 * (weight_bytes + bias_bytes)      # conservative: 2 buffers
    per_row = 2 * (in_p * mm_item + out_p * out_item) + 4 * hid_p * 4
    fit = max((cap_bytes - resident_bytes - (8 << 20)) // per_row, sub)
    tb_cap = int(min(max_tb if max_tb is not None else 2048, fit))
    tb_cap = max(sub, (tb_cap // sub) * sub)

    if B <= tb_cap:
        if v7x and B >= 32:
            # >=2 "parallel" tiles so both v7x TensorCores get work.
            tb = _round_up(_cdiv(B, 2), sub)
            n_tiles = 2
        else:
            tb = _round_up(B, sub)
            n_tiles = 1
    else:
        # Balanced tiles: never pad more than (sub-1) dead rows onto the last tile.
        n_tiles = _cdiv(B, tb_cap)
        tb = _round_up(_cdiv(B, n_tiles), sub)
    B_p = n_tiles * tb
    grid = (n_tiles,)

    # ---- operands (padding / casts skipped when no-ops) --------------------
    xp = _pad2(x, B_p, in_p, matmul_dtype)                 # streamed in matmul dtype
    w1 = _pad2(params["w1"], in_p, hid_p, matmul_dtype)
    w2 = _pad2(params["w2"], hid_p, hid_p, matmul_dtype)
    w3 = _pad2(params["w3"], hid_p, hid_p, matmul_dtype)
    w4 = _pad2(params["w4"], hid_p, out_p, matmul_dtype)
    b123 = _pack_bias_rows((params["b1"], params["b2"], params["b3"]), hid_p)
    b4 = _pack_bias_rows((params["b4"],), out_p)

    # ---- specs --------------------------------------------------------------
    def resident(shape, single_buffer):
        # Constant block index across the grid: fetched once, stays in VMEM.
        if single_buffer:
            return pl.BlockSpec(shape, lambda i: (0, 0),
                                pipeline_mode=pl.Buffered(1))
        return pl.BlockSpec(shape, lambda i: (0, 0))

    flops = 2 * B_p * (in_p * hid_p + 2 * hid_p * hid_p + hid_p * out_p)
    bytes_accessed = int(
        xp.size * xp.dtype.itemsize
        + sum(a.size * a.dtype.itemsize for a in (w1, w2, w3, w4, b123, b4))
        + B_p * out_p * out_item)

    needed = (resident_bytes
              + 2 * tb * (in_p * mm_item + out_p * out_item)
              + 4 * tb * hid_p * 4)
    vmem_limit = int(min(cap_bytes, max(needed + (16 << 20), 32 << 20)))

    def build(single_buffer_weights):
        grid_spec = pltpu.PrefetchScalarGridSpec(
            num_scalar_prefetch=0,
            grid=grid,
            in_specs=[
                pl.BlockSpec((tb, in_p), lambda i: (i, 0)),          # x tile
                resident((in_p, hid_p), single_buffer_weights),      # fc1 W
                resident((hid_p, hid_p), single_buffer_weights),     # tn W1
                resident((hid_p, hid_p), single_buffer_weights),     # tn W2
                resident((hid_p, out_p), single_buffer_weights),     # fc2 W
                resident((3, hid_p), single_buffer_weights),         # b1|b2|b3
                resident((1, out_p), single_buffer_weights),         # b4
            ],
            out_specs=pl.BlockSpec((tb, out_p), lambda i: (i, 0)),
        )
        return pl.pallas_call(
            qtn_kernel,
            out_shape=jax.ShapeDtypeStruct((B_p, out_p), out_dtype),
            grid_spec=grid_spec,
            compiler_params=pltpu.CompilerParams(
                dimension_semantics=("parallel",),
                vmem_limit_bytes=vmem_limit),
            cost_estimate=pl.CostEstimate(
                flops=flops, transcendentals=0, bytes_accessed=bytes_accessed),
        )

    args = (xp, w1, w2, w3, w4, b123, b4)
    try:
        out_padded = build(True)(*args)          # single-buffered resident weights
    except Exception:
        out_padded = build(False)(*args)         # fallback: default double-buffering

    if B_p == B and out_p == out_dim:
        return out_padded
    return out_padded[:B, :out_dim]


def init_params(key, input_dim, hidden_dim, output_dim):
    """Mimics nn.Linear's U(-1/sqrt(fan_in), 1/sqrt(fan_in)).
    Weights stored pre-transposed as (in, out); biases as (1, out)."""
    def linear(k, fan_in, fan_out):
        kw, kb = jax.random.split(k)
        bound = 1.0 / jnp.sqrt(fan_in)
        w = jax.random.uniform(kw, (fan_in, fan_out), jnp.float32, -bound, bound)
        b = jax.random.uniform(kb, (1, fan_out), jnp.float32, -bound, bound)
        return w, b

    k1, k2, k3, k4 = jax.random.split(key, 4)
    w1, b1 = linear(k1, input_dim, hidden_dim)    # fc1
    w2, b2 = linear(k2, hidden_dim, hidden_dim)   # tensor_network[0]
    w3, b3 = linear(k3, hidden_dim, hidden_dim)   # tensor_network[2]
    w4, b4 = linear(k4, hidden_dim, output_dim)   # fc2
    return dict(w1=w1, b1=b1, w2=w2, b2=b2, w3=w3, b3=b3, w4=w4, b4=b4)


def qtn_reference(x, p):
    h = jnp.maximum(x @ p["w1"] + p["b1"], 0.0)
    h = jnp.maximum(h @ p["w2"] + p["b2"], 0.0)
    h = h @ p["w3"] + p["b3"]
    return h @ p["w4"] + p["b4"]


if __name__ == "__main__":
    key = jax.random.PRNGKey(0)
    k_x, k_p = jax.random.split(key)

    batch, input_dim, hidden_dim, output_dim = 16, 32, 32, 16
    x = jax.random.normal(k_x, (batch, input_dim), jnp.float32)
    params = init_params(k_p, input_dim, hidden_dim, output_dim)
    ref = qtn_reference(x, params)

    # 1) f32 MXU operands, single tile — strict check.
    out_f32 = jax.block_until_ready(
        qtn_forward(x, params, matmul_dtype=jnp.float32))
    assert out_f32.shape == (batch, output_dim)
    assert jnp.allclose(out_f32, ref, atol=1e-5, rtol=1e-5), "f32 mismatch"

    # 2) f32, forced multi-tile grid (2 batch tiles) — strict check.
    out_tiled = jax.block_until_ready(
        qtn_forward(x, params, matmul_dtype=jnp.float32, max_tb=8))
    assert jnp.allclose(out_tiled, ref, atol=1e-5, rtol=1e-5), "tiled mismatch"

    # 3) default fast path: bf16 MXU operands, f32 accumulation — loose check.
    out_bf16 = jax.block_until_ready(qtn_forward(x, params))
    assert out_bf16.shape == (batch, output_dim)
    assert jnp.allclose(out_bf16, ref, atol=1e-1, rtol=1e-1), "bf16 mismatch"

    # 4) bf16, unbalanced batch + forced tiling (balanced-tile / padding path).
    xb = jax.random.normal(k_x, (40, input_dim), jnp.float32)
    refb = qtn_reference(xb, params)
    outb = jax.block_until_ready(qtn_forward(xb, params, max_tb=16))
    assert outb.shape == (40, output_dim)
    assert jnp.allclose(outb, refb, atol=1e-1, rtol=1e-1), "bf16 tiled mismatch"

    print("KERNEL_OK")
</pallas_src>

<mosaic_0001>
module attributes {stable_mosaic.version = 11 : i64} {
  func.func @qtn_kernel(%arg0: i32, %arg1: memref<16x128xf32, #tpu.memory_space<vmem>>, %arg2: memref<128x128xf32, #tpu.memory_space<vmem>>, %arg3: memref<128x128xf32, #tpu.memory_space<vmem>>, %arg4: memref<128x128xf32, #tpu.memory_space<vmem>>, %arg5: memref<128x128xf32, #tpu.memory_space<vmem>>, %arg6: memref<3x128xf32, #tpu.memory_space<vmem>>, %arg7: memref<1x128xf32, #tpu.memory_space<vmem>>, %arg8: memref<16x128xf32, #tpu.memory_space<vmem>>) attributes {dimension_semantics = [#tpu.dimension_semantics<parallel>], iteration_bounds = array<i64: 1>, scalar_prefetch = 0 : i64, scratch_operands = 0 : i64, tpu.core_type = #tpu.core_type<tc>, window_params = [{transform_indices = @transform_0, window_bounds = array<i64: 16, 128>}, {pipeline_mode = #tpu.pipeline_mode<synchronous>, transform_indices = @transform_1, window_bounds = array<i64: 128, 128>}, {pipeline_mode = #tpu.pipeline_mode<synchronous>, transform_indices = @transform_2, window_bounds = array<i64: 128, 128>}, {pipeline_mode = #tpu.pipeline_mode<synchronous>, transform_indices = @transform_3, window_bounds = array<i64: 128, 128>}, {pipeline_mode = #tpu.pipeline_mode<synchronous>, transform_indices = @transform_4, window_bounds = array<i64: 128, 128>}, {pipeline_mode = #tpu.pipeline_mode<synchronous>, transform_indices = @transform_5, window_bounds = array<i64: 3, 128>}, {pipeline_mode = #tpu.pipeline_mode<synchronous>, transform_indices = @transform_6, window_bounds = array<i64: 1, 128>}, {transform_indices = @transform_7, window_bounds = array<i64: 16, 128>}]} {
    %c0 = arith.constant 0 : index
    %c0_0 = arith.constant 0 : index
    %0 = vector.load %arg1[%c0, %c0_0] : memref<16x128xf32, #tpu.memory_space<vmem>>, vector<16x128xf32>
    %c0_1 = arith.constant 0 : index
    %c0_2 = arith.constant 0 : index
    %1 = vector.load %arg2[%c0_1, %c0_2] : memref<128x128xf32, #tpu.memory_space<vmem>>, vector<128x128xf32>
    %cst = arith.constant dense<0.000000e+00> : vector<16x128xf32>
    %2 = tpu.matmul %0, %1, %cst {dimension_numbers = #tpu.dot_dimension_numbers<[1], [0], [0], [1], [0, 0, 1, 1], [], []>} : vector<16x128xf32>, vector<128x128xf32>, vector<16x128xf32> -> vector<16x128xf32>
    %c0_3 = arith.constant 0 : index
    %c0_4 = arith.constant 0 : index
    %3 = vector.load %arg6[%c0_3, %c0_4] : memref<3x128xf32, #tpu.memory_space<vmem>>, vector<1x128xf32>
    %4 = vector.broadcast %3 : vector<1x128xf32> to vector<16x128xf32>
    %5 = arith.addf %2, %4 : vector<16x128xf32>
    %cst_5 = arith.constant 0.000000e+00 : f32
    %6 = vector.broadcast %cst_5 : f32 to vector<16x128xf32>
    %7 = arith.maximumf %5, %6 : vector<16x128xf32>
    %c0_6 = arith.constant 0 : index
    %c0_7 = arith.constant 0 : index
    %8 = vector.load %arg3[%c0_6, %c0_7] : memref<128x128xf32, #tpu.memory_space<vmem>>, vector<128x128xf32>
    %cst_8 = arith.constant dense<0.000000e+00> : vector<16x128xf32>
    %9 = tpu.matmul %7, %8, %cst_8 {dimension_numbers = #tpu.dot_dimension_numbers<[1], [0], [0], [1], [0, 0, 1, 1], [], []>} : vector<16x128xf32>, vector<128x128xf32>, vector<16x128xf32> -> vector<16x128xf32>
    %c1 = arith.constant 1 : index
    %c0_9 = arith.constant 0 : index
    %10 = vector.load %arg6[%c1, %c0_9] : memref<3x128xf32, #tpu.memory_space<vmem>>, vector<1x128xf32>
    %11 = vector.broadcast %10 : vector<1x128xf32> to vector<16x128xf32>
    %12 = arith.addf %9, %11 : vector<16x128xf32>
    %cst_10 = arith.constant 0.000000e+00 : f32
    %13 = vector.broadcast %cst_10 : f32 to vector<16x128xf32>
    %14 = arith.maximumf %12, %13 : vector<16x128xf32>
    %c0_11 = arith.constant 0 : index
    %c0_12 = arith.constant 0 : index
    %15 = vector.load %arg4[%c0_11, %c0_12] : memref<128x128xf32, #tpu.memory_space<vmem>>, vector<128x128xf32>
    %cst_13 = arith.constant dense<0.000000e+00> : vector<16x128xf32>
    %16 = tpu.matmul %14, %15, %cst_13 {dimension_numbers = #tpu.dot_dimension_numbers<[1], [0], [0], [1], [0, 0, 1, 1], [], []>} : vector<16x128xf32>, vector<128x128xf32>, vector<16x128xf32> -> vector<16x128xf32>
    %c2 = arith.constant 2 : index
    %c0_14 = arith.constant 0 : index
    %17 = vector.load %arg6[%c2, %c0_14] : memref<3x128xf32, #tpu.memory_space<vmem>>, vector<1x128xf32>
    %18 = vector.broadcast %17 : vector<1x128xf32> to vector<16x128xf32>
    %19 = arith.addf %16, %18 : vector<16x128xf32>
    %c0_15 = arith.constant 0 : index
    %c0_16 = arith.constant 0 : index
    %20 = vector.load %arg5[%c0_15, %c0_16] : memref<128x128xf32, #tpu.memory_space<vmem>>, vector<128x128xf32>
    %cst_17 = arith.constant dense<0.000000e+00> : vector<16x128xf32>
    %21 = tpu.matmul %19, %20, %cst_17 {dimension_numbers = #tpu.dot_dimension_numbers<[1], [0], [0], [1], [0, 0, 1, 1], [], []>} : vector<16x128xf32>, vector<128x128xf32>, vector<16x128xf32> -> vector<16x128xf32>
    %c0_18 = arith.constant 0 : index
    %c0_19 = arith.constant 0 : index
    %22 = vector.load %arg7[%c0_18, %c0_19] : memref<1x128xf32, #tpu.memory_space<vmem>>, vector<1x128xf32>
    %23 = vector.broadcast %22 : vector<1x128xf32> to vector<16x128xf32>
    %24 = arith.addf %21, %23 : vector<16x128xf32>
    %c0_20 = arith.constant 0 : index
    %c0_21 = arith.constant 0 : index
    %25 = vector.load %arg8[%c0_20, %c0_21] : memref<16x128xf32, #tpu.memory_space<vmem>>, vector<16x128xf32>
    tpu.vector_store %arg8[%c0_20, %c0_21], %24 {strides = array<i32>} : memref<16x128xf32, #tpu.memory_space<vmem>>, vector<16x128xf32>,
    return
  }
  func.func @transform_0(%arg0: i32) -> (i32, i32) {
    %c0_i32 = arith.constant 0 : i32
    %c0_i32_0 = arith.constant 0 : i32
    return %arg0, %c0_i32 : i32, i32
  }
  func.func @transform_1(%arg0: i32) -> (i32, i32) {
    %c0_i32 = arith.constant 0 : i32
    %c0_i32_0 = arith.constant 0 : i32
    %c0_i32_1 = arith.constant 0 : i32
    return %c0_i32, %c0_i32_0 : i32, i32
  }
  func.func @transform_2(%arg0: i32) -> (i32, i32) {
    %c0_i32 = arith.constant 0 : i32
    %c0_i32_0 = arith.constant 0 : i32
    %c0_i32_1 = arith.constant 0 : i32
    return %c0_i32, %c0_i32_0 : i32, i32
  }
  func.func @transform_3(%arg0: i32) -> (i32, i32) {
    %c0_i32 = arith.constant 0 : i32
    %c0_i32_0 = arith.constant 0 : i32
    %c0_i32_1 = arith.constant 0 : i32
    return %c0_i32, %c0_i32_0 : i32, i32
  }
  func.func @transform_4(%arg0: i32) -> (i32, i32) {
    %c0_i32 = arith.constant 0 : i32
    %c0_i32_0 = arith.constant 0 : i32
    %c0_i32_1 = arith.constant 0 : i32
    return %c0_i32, %c0_i32_0 : i32, i32
  }
  func.func @transform_5(%arg0: i32) -> (i32, i32) {
    %c0_i32 = arith.constant 0 : i32
    %c0_i32_0 = arith.constant 0 : i32
    %c0_i32_1 = arith.constant 0 : i32
    return %c0_i32, %c0_i32_0 : i32, i32
  }
  func.func @transform_6(%arg0: i32) -> (i32, i32) {
    %c0_i32 = arith.constant 0 : i32
    %c0_i32_0 = arith.constant 0 : i32
    %c0_i32_1 = arith.constant 0 : i32
    return %c0_i32, %c0_i32_0 : i32, i32
  }
  func.func @transform_7(%arg0: i32) -> (i32, i32) {
    %c0_i32 = arith.constant 0 : i32
    %c0_i32_0 = arith.constant 0 : i32
    return %arg0, %c0_i32 : i32, i32
  }
}

module attributes {stable_mosaic.version = 11 : i64} {
  func.func @qtn_kernel(%arg0: i32, %arg1: memref<16x128xf32, #tpu.memory_space<vmem>>, %arg2: memref<128x128xf32, #tpu.memory_space<vmem>>, %arg3: memref<128x128xf32, #tpu.memory_space<vmem>>, %arg4: memref<128x128xf32, #tpu.memory_space<vmem>>, %arg5: memref<128x128xf32, #tpu.memory_space<vmem>>, %arg6: memref<3x128xf32, #tpu.memory_space<vmem>>, %arg7: memref<1x128xf32, #tpu.memory_space<vmem>>, %arg8: memref<16x128xf32, #tpu.memory_space<vmem>>) attributes {dimension_semantics = [#tpu.dimension_semantics<parallel>], iteration_bounds = array<i64: 1>, scalar_prefetch = 0 : i64, scratch_operands = 0 : i64, tpu.core_type = #tpu.core_type<tc>, window_params = [{transform_indices = @transform_0, window_bounds = array<i64: 16, 128>}, {pipeline_mode = #tpu.pipeline_mode<synchronous>, transform_indices = @transform_1, window_bounds = array<i64: 128, 128>}, {pipeline_mode = #tpu.pipeline_mode<synchronous>, transform_indices = @transform_2, window_bounds = array<i64: 128, 128>}, {pipeline_mode = #tpu.pipeline_mode<synchronous>, transform_indices = @transform_3, window_bounds = array<i64: 128, 128>}, {pipeline_mode = #tpu.pipeline_mode<synchronous>, transform_indices = @transform_4, window_bounds = array<i64: 128, 128>}, {pipeline_mode = #tpu.pipeline_mode<synchronous>, transform_indices = @transform_5, window_bounds = array<i64: 3, 128>}, {pipeline_mode = #tpu.pipeline_mode<synchronous>, transform_indices = @transform_6, window_bounds = array<i64: 1, 128>}, {transform_indices = @transform_7, window_bounds = array<i64: 16, 128>}]} {
    %c0 = arith.constant 0 : index
    %c0_0 = arith.constant 0 : index
    %0 = vector.load %arg1[%c0, %c0_0] : memref<16x128xf32, #tpu.memory_space<vmem>>, vector<16x128xf32>
    %c0_1 = arith.constant 0 : index
    %c0_2 = arith.constant 0 : index
    %1 = vector.load %arg2[%c0_1, %c0_2] : memref<128x128xf32, #tpu.memory_space<vmem>>, vector<128x128xf32>
    %cst = arith.constant dense<0.000000e+00> : vector<16x128xf32>
    %2 = tpu.matmul %0, %1, %cst {dimension_numbers = #tpu.dot_dimension_numbers<[1], [0], [0], [1], [0, 0, 1, 1], [], []>} : vector<16x128xf32>, vector<128x128xf32>, vector<16x128xf32> -> vector<16x128xf32>
    %c0_3 = arith.constant 0 : index
    %c0_4 = arith.constant 0 : index
    %3 = vector.load %arg6[%c0_3, %c0_4] : memref<3x128xf32, #tpu.memory_space<vmem>>, vector<1x128xf32>
    %4 = vector.broadcast %3 : vector<1x128xf32> to vector<16x128xf32>
    %5 = arith.addf %2, %4 : vector<16x128xf32>
    %cst_5 = arith.constant 0.000000e+00 : f32
    %6 = vector.broadcast %cst_5 : f32 to vector<16x128xf32>
    %7 = arith.maximumf %5, %6 : vector<16x128xf32>
    %c0_6 = arith.constant 0 : index
    %c0_7 = arith.constant 0 : index
    %8 = vector.load %arg3[%c0_6, %c0_7] : memref<128x128xf32, #tpu.memory_space<vmem>>, vector<128x128xf32>
    %cst_8 = arith.constant dense<0.000000e+00> : vector<16x128xf32>
    %9 = tpu.matmul %7, %8, %cst_8 {dimension_numbers = #tpu.dot_dimension_numbers<[1], [0], [0], [1], [0, 0, 1, 1], [], []>} : vector<16x128xf32>, vector<128x128xf32>, vector<16x128xf32> -> vector<16x128xf32>
    %c1 = arith.constant 1 : index
    %c0_9 = arith.constant 0 : index
    %10 = vector.load %arg6[%c1, %c0_9] : memref<3x128xf32, #tpu.memory_space<vmem>>, vector<1x128xf32>
    %11 = vector.broadcast %10 : vector<1x128xf32> to vector<16x128xf32>
    %12 = arith.addf %9, %11 : vector<16x128xf32>
    %cst_10 = arith.constant 0.000000e+00 : f32
    %13 = vector.broadcast %cst_10 : f32 to vector<16x128xf32>
    %14 = arith.maximumf %12, %13 : vector<16x128xf32>
    %c0_11 = arith.constant 0 : index
    %c0_12 = arith.constant 0 : index
    %15 = vector.load %arg4[%c0_11, %c0_12] : memref<128x128xf32, #tpu.memory_space<vmem>>, vector<128x128xf32>
    %cst_13 = arith.constant dense<0.000000e+00> : vector<16x128xf32>
    %16 = tpu.matmul %14, %15, %cst_13 {dimension_numbers = #tpu.dot_dimension_numbers<[1], [0], [0], [1], [0, 0, 1, 1], [], []>} : vector<16x128xf32>, vector<128x128xf32>, vector<16x128xf32> -> vector<16x128xf32>
    %c2 = arith.constant 2 : index
    %c0_14 = arith.constant 0 : index
    %17 = vector.load %arg6[%c2, %c0_14] : memref<3x128xf32, #tpu.memory_space<vmem>>, vector<1x128xf32>
    %18 = vector.broadcast %17 : vector<1x128xf32> to vector<16x128xf32>
    %19 = arith.addf %16, %18 : vector<16x128xf32>
    %c0_15 = arith.constant 0 : index
    %c0_16 = arith.constant 0 : index
    %20 = vector.load %arg5[%c0_15, %c0_16] : memref<128x128xf32, #tpu.memory_space<vmem>>, vector<128x128xf32>
    %cst_17 = arith.constant dense<0.000000e+00> : vector<16x128xf32>
    %21 = tpu.matmul %19, %20, %cst_17 {dimension_numbers = #tpu.dot_dimension_numbers<[1], [0], [0], [1], [0, 0, 1, 1], [], []>} : vector<16x128xf32>, vector<128x128xf32>, vector<16x128xf32> -> vector<16x128xf32>
    %c0_18 = arith.constant 0 : index
    %c0_19 = arith.constant 0 : index
    %22 = vector.load %arg7[%c0_18, %c0_19] : memref<1x128xf32, #tpu.memory_space<vmem>>, vector<1x128xf32>
    %23 = vector.broadcast %22 : vector<1x128xf32> to vector<16x128xf32>
    %24 = arith.addf %21, %23 : vector<16x128xf32>
    %c0_20 = arith.constant 0 : index
    %c0_21 = arith.constant 0 : index
    %25 = vector.load %arg8[%c0_20, %c0_21] : memref<16x128xf32, #tpu.memory_space<vmem>>, vector<16x128xf32>
    tpu.vector_store %arg8[%c0_20, %c0_21], %24 {strides = array<i32>} : memref<16x128xf32, #tpu.memory_space<vmem>>, vector<16x128xf32>,
    return
  }
  func.func @transform_0(%arg0: i32) -> (i32, i32) {
    %c0_i32 = arith.constant 0 : i32
    %c0_i32_0 = arith.constant 0 : i32
    return %arg0, %c0_i32 : i32, i32
  }
  func.func @transform_1(%arg0: i32) -> (i32, i32) {
    %c0_i32 = arith.constant 0 : i32
    %c0_i32_0 = arith.constant 0 : i32
    %c0_i32_1 = arith.constant 0 : i32
    return %c0_i32, %c0_i32_0 : i32, i32
  }
  func.func @transform_2(%arg0: i32) -> (i32, i32) {
    %c0_i32 = arith.constant 0 : i32
    %c0_i32_0 = arith.constant 0 : i32
    %c0_i32_1 = arith.constant 0 : i32
    return %c0_i32, %c0_i32_0 : i32, i32
  }
  func.func @transform_3(%arg0: i32) -> (i32, i32) {
    %c0_i32 = arith.constant 0 : i32
    %c0_i32_0 = arith.constant 0 : i32
    %c0_i32_1 = arith.constant 0 : i32
    return %c0_i32, %c0_i32_0 : i32, i32
  }
  func.func @transform_4(%arg0: i32) -> (i32, i32) {
    %c0_i32 = arith.constant 0 : i32
    %c0_i32_0 = arith.constant 0 : i32
    %c0_i32_1 = arith.constant 0 : i32
    return %c0_i32, %c0_i32_0 : i32, i32
  }
  func.func @transform_5(%arg0: i32) -> (i32, i32) {
    %c0_i32 = arith.constant 0 : i32
    %c0_i32_0 = arith.constant 0 : i32
    %c0_i32_1 = arith.constant 0 : i32
    return %c0_i32, %c0_i32_0 : i32, i32
  }
  func.func @transform_6(%arg0: i32) -> (i32, i32) {
    %c0_i32 = arith.constant 0 : i32
    %c0_i32_0 = arith.constant 0 : i32
    %c0_i32_1 = arith.constant 0 : i32
    return %c0_i32, %c0_i32_0 : i32, i32
  }
  func.func @transform_7(%arg0: i32) -> (i32, i32) {
    %c0_i32 = arith.constant 0 : i32
    %c0_i32_0 = arith.constant 0 : i32
    return %arg0, %c0_i32 : i32, i32
  }
}

</mosaic_0001>

<bundles_post_ra>
// kernel: tpu_custom_call.1
= control target key start
LH: loop header
LB: loop body
LE: loop exit
PB: predicated region body
PF: predicated region fallthrough
CT: control target
= control target key end

     0   :  { %12 = vsyncpa [#allocation3], 0  ;;  %s560_s0 = inlined_call_operand.hbm [shape: f32[16,128], index: 0, kind: input, shape index: {}]   ;;  %s561_s1 = inlined_call_operand.hbm [shape: f32[128,128], index: 1, kind: input, shape index: {}]   ;;  %s562_s2 = inlined_call_operand.hbm [shape: f32[128,128], index: 2, kind: input, shape index: {}]   ;;  %s563_s3 = inlined_call_operand.hbm [shape: f32[128,128], index: 3, kind: input, shape index: {}]   ;;  %s564_s4 = inlined_call_operand.hbm [shape: f32[128,128], index: 4, kind: input, shape index: {}]   ;;  %s565_s5 = inlined_call_operand.vmem [shape: f32[3,128], index: 5, kind: input, shape index: {}]   ;;  %s566_s6 = inlined_call_operand.vmem [shape: f32[1,128], index: 6, kind: input, shape index: {}]   ;;  %s567_s7 = inlined_call_operand.hbm [shape: f32[16,128], index: 7, kind: output, shape index: {}]  }
   0x1   :  { %13 = vsyncpa [#allocation6], 0 }
   0x2   :  { %14 = vsyncpa [#allocation9], 0 }
   0x3   :  { %15 = vsyncpa [#allocation4], 0  ;;  %s33_s26 = sshll.u32 %s561_s1, 4  ;;  %s464_s27 = smov [#allocation5]   ;;  %s34_s26 = int_to_ptr.hbm [resolvable:$true] %s33_s26 }
   0x4   :  { %s35_s28 = sshll.u32 %s464_s27, 4  ;;  %s59_s8 = sshll.u32 %s563_s3, 4  ;;  %s36_s28 = int_to_ptr.vmem [resolvable:$true] %s35_s28  ;;  %s60_s8 = int_to_ptr.hbm [resolvable:$true] %s59_s8 }
   0x5   :  { %s465_s9 = smov 128   ;;  %s466_s10 = smov 8  }
   0x6   :  { %41 = dma.hbm_to_vmem [thread:$0]  %s34_s26, 2048, %s36_s28, [#allocation6], %s465_s9, %s465_s9, %s466_s10  }
   0x7   :  { %s467_s11 = smov [#allocation8]   ;;  %s20_s1 = sshll.u32 %s560_s0, 4  ;;  %s21_s1 = int_to_ptr.hbm [resolvable:$true] %s20_s1 }
   0x8   :  { %s61_s12 = sshll.u32 %s467_s11, 4  ;;  %s46_s16 = sshll.u32 %s562_s2, 4  ;;  %s62_s12 = int_to_ptr.vmem [resolvable:$true] %s61_s12  ;;  %s47_s16 = int_to_ptr.hbm [resolvable:$true] %s46_s16 }
   0x9   :  { %67 = dma.hbm_to_vmem [thread:$0]  %s60_s8, 2048, %s62_s12, [#allocation9], %s465_s9, %s465_s9, %s466_s10  }
   0xa   :  { %s468_s17 = smov [#allocation2]   ;;  %s469_s19 = smov [#allocation7]  }
   0xb   :  { %s22_s18 = sshll.u32 %s468_s17, 4  ;;  %s48_s0 = sshll.u32 %s469_s19, 4  ;;  %s23_s18 = int_to_ptr.vmem [resolvable:$true] %s22_s18  ;;  %s49_s0 = int_to_ptr.vmem [resolvable:$true] %s48_s0 }
   0xc   :  { %28 = dma.hbm_to_vmem [thread:$0]  %s21_s1, 256, %s23_s18, [#allocation3], %s465_s9, %s465_s9, %s466_s10  }
   0xd   :  { %s72_s22 = sshll.u32 %s564_s4, 4  ;;  %s470_s2 = smov [#allocation10]   ;;  %s73_s22 = int_to_ptr.hbm [resolvable:$true] %s72_s22 }
   0xe   :  { %54 = dma.hbm_to_vmem [thread:$0]  %s47_s16, 2048, %s49_s0, [#allocation6], %s465_s9, %s465_s9, %s466_s10  }
   0xf   :  { %s74_s23 = sshll.u32 %s470_s2, 4  ;;  %s75_s23 = int_to_ptr.vmem [resolvable:$true] %s74_s23 }
  0x10   :  { %80 = dma.hbm_to_vmem [thread:$0]  %s73_s22, 2048, %s75_s23, [#allocation9], %s465_s9, %s465_s9, %s466_s10  }
  0x11   :  { %456 = dma.done.wait [#allocation3], 256  }
  0x12   :  { %457 = vsyncadd [#allocation3], 4294967040 }
  0x13   :  { %458 = dma.done.wait [#allocation6], 4096  }
  0x14   :  { %459 = vsyncadd [#allocation6], 4294963200 }
  0x15   :  { %460 = dma.done.wait [#allocation9], 4096  }
  0x16   :  { %461 = vsyncadd [#allocation9], 4294963200  ;;  %v122_v0 = vld [vmem:[#allocation5 + $0x78] sm:$0xff]  ;;  %v121_v1 = vld [vmem:[#allocation5 + $0x70] sm:$0xff]  ;;  %s471_s8 = smov [#allocation11]   ;;  %s285_s14 = sshll.u32 %s567_s7, 4  ;;  %s286_s14 = int_to_ptr.hbm [resolvable:$true] %s285_s14 }
  0x17   :  { %125 = vmatpush.msra.mxu0 %v122_v0  ;;  %v120_v2 = vld [vmem:[#allocation5 + $0x68] sm:$0xff]  ;;  %v119_v3 = vld [vmem:[#allocation5 + $0x60] sm:$0xff]  ;;  %v118_v4 = vld [vmem:[#allocation5 + $0x58] sm:$0xff]  ;;  %s283_s11 = sshll.u32 %s471_s8, 4  ;;  %s284_s11 = int_to_ptr.vmem [resolvable:$true] %s283_s11 }
  0x18   :  { %v117_v5 = vld [vmem:[#allocation5 + $0x50] sm:$0xff]  ;;  %v165_v6 = vld [vmem:[#allocation7 + $0x78] sm:$0xff]  ;;  %v116_v8 = vld [vmem:[#allocation5 + $0x48] sm:$0xff] }
  0x19   :  { %126 = vmatpush.msra.mxu0 %v121_v1  ;;  %v164_v7 = vld [vmem:[#allocation7 + $0x70] sm:$0xff]  ;;  %168 = vmatpush.msra.mxu1 %v165_v6  ;;  %v163_v9 = vld [vmem:[#allocation7 + $0x68] sm:$0xff]  ;;  %v115_v10 = vld [vmem:[#allocation5 + $0x40] sm:$0xff] }
  0x1a   :  { %v162_v11 = vld [vmem:[#allocation7 + $0x60] sm:$0xff]  ;;  %v114_v12 = vld [vmem:[#allocation5 + $0x38] sm:$0xff]  ;;  %v113_v14 = vld [vmem:[#allocation5 + $0x30] sm:$0xff] }
  0x1b   :  { %127 = vmatpush.msra.mxu0 %v120_v2  ;;  %169 = vmatpush.msra.mxu1 %v164_v7  ;;  %v161_v13 = vld [vmem:[#allocation7 + $0x58] sm:$0xff]  ;;  %v160_v15 = vld [vmem:[#allocation7 + $0x50] sm:$0xff]  ;;  %v112_v16 = vld [vmem:[#allocation5 + $0x28] sm:$0xff] }
  0x1c   :  { %v159_v17 = vld [vmem:[#allocation7 + $0x48] sm:$0xff]  ;;  %v111_v18 = vld [vmem:[#allocation5 + $0x20] sm:$0xff]  ;;  %v110_v20 = vld [vmem:[#allocation5 + $0x18] sm:$0xff] }
  0x1d   :  { %128 = vmatpush.msra.mxu0 %v119_v3  ;;  %170 = vmatpush.msra.mxu1 %v163_v9  ;;  %v158_v19 = vld [vmem:[#allocation7 + $0x40] sm:$0xff]  ;;  %v157_v21 = vld [vmem:[#allocation7 + $0x38] sm:$0xff]  ;;  %v109_v22 = vld [vmem:[#allocation5 + $0x10] sm:$0xff] }
  0x1e   :  { %v156_v23 = vld [vmem:[#allocation7 + $0x30] sm:$0xff]  ;;  %v108_v24 = vld [vmem:[#allocation5 + $0x8] sm:$0xff]  ;;  %v107_v26 = vld [vmem:[#allocation5] sm:$0xff] }
  0x1f   :  { %129 = vmatpush.msra.mxu0 %v118_v4  ;;  %171 = vmatpush.msra.mxu1 %v162_v11  ;;  %v155_v25 = vld [vmem:[#allocation7 + $0x28] sm:$0xff]  ;;  %v154_v27 = vld [vmem:[#allocation7 + $0x20] sm:$0xff]  ;;  %v105_v28 = vld [vmem:[#allocation2] sm:$0xff] }
  0x20   :  { %v153_v29 = vld [vmem:[#allocation7 + $0x18] sm:$0xff]  ;;  %v152_v31 = vld [vmem:[#allocation7 + $0x10] sm:$0xff]  ;;  %v151_v32 = vld [vmem:[#allocation7 + $0x8] sm:$0xff] }
  0x21   :  { %130 = vmatpush.msra.mxu0 %v117_v5  ;;  %172 = vmatpush.msra.mxu1 %v161_v13  ;;  %v106_v30 = vld [vmem:[#allocation2 + $0x8] sm:$0xff]  ;;  %v150_v33 = vld [vmem:[#allocation7] sm:$0xff]  ;;  %v207_v35 = vld [vmem:[#allocation8 + $0x70] sm:$0xff] }
  0x22   :  { %v208_v34 = vld [vmem:[#allocation8 + $0x78] sm:$0xff]  ;;  %v206_v36 = vld [vmem:[#allocation8 + $0x68] sm:$0xff]  ;;  %v205_v37 = vld [vmem:[#allocation8 + $0x60] sm:$0xff] }
  0x23   :  { %131 = vmatpush.msra.mxu0 %v116_v8  ;;  %173 = vmatpush.msra.mxu1 %v160_v15  ;;  %v204_v38 = vld [vmem:[#allocation8 + $0x58] sm:$0xff]  ;;  %v203_v39 = vld [vmem:[#allocation8 + $0x50] sm:$0xff]  ;;  %v202_v40 = vld [vmem:[#allocation8 + $0x48] sm:$0xff] }
  0x24   :  { %211 = vmatpush.msra.mxu2 %v208_v34  ;;  %v201_v41 = vld [vmem:[#allocation8 + $0x40] sm:$0xff]  ;;  %v200_v42 = vld [vmem:[#allocation8 + $0x38] sm:$0xff]  ;;  %v308_v43 = vld [vmem:[%s565_s5] ss:$0 sm:$0xff] }
  0x25   :  { %132 = vmatpush.msra.mxu0 %v115_v10  ;;  %174 = vmatpush.msra.mxu1 %v159_v17  ;;  %v199_v44 = vld [vmem:[#allocation8 + $0x30] sm:$0xff]  ;;  %v198_v45 = vld [vmem:[#allocation8 + $0x28] sm:$0xff]  ;;  %v197_v48 = vld [vmem:[#allocation8 + $0x20] sm:$0xff] }
  0x26   :  { %212 = vmatpush.msra.mxu2 %v207_v35  ;;  %v196_v50 = vld [vmem:[#allocation8 + $0x18] sm:$0xff]  ;;  %v195_v54 = vld [vmem:[#allocation8 + $0x10] sm:$0xff]  ;;  %v194_v55 = vld [vmem:[#allocation8 + $0x8] sm:$0xff] }
  0x27   :  { %133 = vmatpush.msra.mxu0 %v114_v12  ;;  %175 = vmatpush.msra.mxu1 %v158_v19  ;;  %v193_v56 = vld [vmem:[#allocation8] sm:$0xff]  ;;  %v249_v57 = vld [vmem:[#allocation10 + $0x78] sm:$0xff]  ;;  %v248_v58 = vld [vmem:[#allocation10 + $0x70] sm:$0xff] }
  0x28   :  { %213 = vmatpush.msra.mxu2 %v206_v36  ;;  %254 = vmatpush.msra.mxu3 %v249_v57  ;;  %v247_v59 = vld [vmem:[#allocation10 + $0x68] sm:$0xff]  ;;  %v246_v60 = vld [vmem:[#allocation10 + $0x60] sm:$0xff]  ;;  %v245_v61 = vld [vmem:[#allocation10 + $0x58] sm:$0xff] }
  0x29   :  { %134 = vmatpush.msra.mxu0 %v113_v14  ;;  %176 = vmatpush.msra.mxu1 %v157_v21  ;;  %v244_v62 = vld [vmem:[#allocation10 + $0x50] sm:$0xff]  ;;  %v243_v63 = vld [vmem:[#allocation10 + $0x48] sm:$0xff]  ;;  %v242_v0 = vld [vmem:[#allocation10 + $0x40] sm:$0xff] }
  0x2a   :  { %214 = vmatpush.msra.mxu2 %v205_v37  ;;  %255 = vmatpush.msra.mxu3 %v248_v58  ;;  %v241_v1 = vld [vmem:[#allocation10 + $0x38] sm:$0xff]  ;;  %v309_v2 = vld [vmem:[%s565_s5 + $0x1] ss:$0 sm:$0xff]  ;;  %v239_v4 = vld [vmem:[#allocation10 + $0x28] sm:$0xff] }
  0x2b   :  { %135 = vmatpush.msra.mxu0 %v112_v16  ;;  %177 = vmatpush.msra.mxu1 %v156_v23  ;;  %v240_v3 = vld [vmem:[#allocation10 + $0x30] sm:$0xff]  ;;  %v238_v7 = vld [vmem:[#allocation10 + $0x20] sm:$0xff]  ;;  %v237_v9 = vld [vmem:[#allocation10 + $0x18] sm:$0xff] }
  0x2c   :  { %215 = vmatpush.msra.mxu2 %v204_v38  ;;  %256 = vmatpush.msra.mxu3 %v247_v59  ;;  %v236_v10 = vld [vmem:[#allocation10 + $0x10] sm:$0xff]  ;;  %v235_v14 = vld [vmem:[#allocation10 + $0x8] sm:$0xff]  ;;  %v234_v15 = vld [vmem:[#allocation10] sm:$0xff] }
  0x2d   :  { %136 = vmatpush.msra.mxu0 %v111_v18  ;;  %178 = vmatpush.msra.mxu1 %v155_v25  ;;  %v310_v16 = vld [vmem:[%s565_s5 + $0x2] ss:$0 sm:$0xff]  ;;  %v311_v21 = vld [vmem:[%s566_s6] ss:$0 sm:$0xff] }
  0x2e   :  { %216 = vmatpush.msra.mxu2 %v203_v39  ;;  %257 = vmatpush.msra.mxu3 %v246_v60 }
  0x2f   :  { %137 = vmatpush.msra.mxu0 %v110_v20  ;;  %179 = vmatpush.msra.mxu1 %v154_v27 }
  0x30   :  { %217 = vmatpush.msra.mxu2 %v202_v40  ;;  %258 = vmatpush.msra.mxu3 %v245_v61 }
  0x31   :  { %138 = vmatpush.msra.mxu0 %v109_v22  ;;  %180 = vmatpush.msra.mxu1 %v153_v29 }
  0x32   :  { %218 = vmatpush.msra.mxu2 %v201_v41  ;;  %259 = vmatpush.msra.mxu3 %v244_v62 }
  0x33   :  { %139 = vmatpush.msra.mxu0 %v108_v24  ;;  %181 = vmatpush.msra.mxu1 %v152_v31 }
  0x34   :  { %219 = vmatpush.msra.mxu2 %v200_v42  ;;  %260 = vmatpush.msra.mxu3 %v243_v63 }
  0x35   :  { %140 = vmatpush.msra.mxu0 %v107_v26  ;;  %182 = vmatpush.msra.mxu1 %v151_v32 }
  0x36   :  { %141 = vmatmul.f32.vlgmr.msra.gmra.mxu0 %v105_v28  ;;  %220 = vmatpush.msra.mxu2 %v199_v44 }
  0x37   :  { %183 = vmatpush.msra.mxu1 %v150_v33  ;;  %261 = vmatpush.msra.mxu3 %v242_v0 }
  0x38   :  { %221 = vmatpush.msra.mxu2 %v198_v45 }
  0x39   :  { %262 = vmatpush.msra.mxu3 %v241_v1 }
  0x3a   :  { %222 = vmatpush.msra.mxu2 %v197_v48 }
  0x3b   :  { %263 = vmatpush.msra.mxu3 %v240_v3 }
  0x3c   :  { %223 = vmatpush.msra.mxu2 %v196_v50 }
  0x3d   :  { %264 = vmatpush.msra.mxu3 %v239_v4 }
  0x3e   :  { %144 = vmatmul.f32.gmra.mxu0 %v106_v30  ;;  %224 = vmatpush.msra.mxu2 %v195_v54 }
  0x3f   :  { %265 = vmatpush.msra.mxu3 %v238_v7 }
  0x40   :  { %225 = vmatpush.msra.mxu2 %v194_v55 }
  0x41   :  { %266 = vmatpush.msra.mxu3 %v237_v9 }
  0x42   :  { %226 = vmatpush.msra.mxu2 %v193_v56 }
  0x43   :  { %267 = vmatpush.msra.mxu3 %v236_v10 }
  0x45   :  { %268 = vmatpush.msra.mxu3 %v235_v14 }
  0x47   :  { %269 = vmatpush.msra.mxu3 %v234_v15 }
  0xb3   :  { %v142_v46 = vpop.f32.mrf.mxu0 }
  0xb4   :  { %v143_v47 = vadd.f32 %v308_v43, %v142_v46 }
  0xb6   :  { %v148_v49 = vmax.f32 %v143_v47, 0.0 }
  0xb8   :  { %184 = vmatmul.f32.vlgmr.msra.gmra.mxu1 %v148_v49 }
  0xbb   :  { %v145_v51 = vpop.f32.mrf.mxu0 }
  0xbc   :  { %v146_v52 = vadd.f32 %v308_v43, %v145_v51 }
  0xbe   :  { %v149_v53 = vmax.f32 %v146_v52, 0.0 }
  0xc0   :  { %187 = vmatmul.f32.gmra.mxu1 %v149_v53 }
 0x135   :  { %v185_v5 = vpop.f32.mrf.mxu1 }
 0x136   :  { %v186_v6 = vadd.f32 %v309_v2, %v185_v5 }
 0x138   :  { %v191_v8 = vmax.f32 %v186_v6, 0.0 }
 0x13a   :  { %227 = vmatmul.f32.vlgmr.msra.gmra.mxu2 %v191_v8 }
 0x13d   :  { %v188_v11 = vpop.f32.mrf.mxu1 }
 0x13e   :  { %v189_v12 = vadd.f32 %v309_v2, %v188_v11 }
 0x140   :  { %v192_v13 = vmax.f32 %v189_v12, 0.0 }
 0x142   :  { %230 = vmatmul.f32.gmra.mxu2 %v192_v13 }
 0x1bd   :  { %v228_v17 = vpop.f32.mrf.mxu2 }
 0x1be   :  { %v229_v18 = vadd.f32 %v310_v16, %v228_v17 }
 0x1c0   :  { %270 = vmatmul.f32.vlgmr.msra.gmra.mxu3 %v229_v18 }
 0x1c5   :  { %v231_v19 = vpop.f32.mrf.mxu2 }
 0x1c6   :  { %v232_v20 = vadd.f32 %v310_v16, %v231_v19 }
 0x1c8   :  { %273 = vmatmul.f32.gmra.mxu3 %v232_v20 }
 0x243   :  { %v271_v22 = vpop.f32.mrf.mxu3 }
 0x244   :  { %v272_v23 = vadd.f32 %v311_v21, %v271_v22 }
 0x246   :  { %277 = vst [vmem:[#allocation11] sm:$0xff] %v272_v23 }
 0x24b   :  { %v274_v24 = vpop.f32.mrf.mxu3 }
 0x24c   :  { %v275_v25 = vadd.f32 %v311_v21, %v274_v24 }
 0x24e   :  { %278 = vst [vmem:[#allocation11 + $0x8] sm:$0xff] %v275_v25 }
 0x24f   :  { %291 = dma.vmem_to_hbm [thread:$0]  %s284_s11, 256, %s286_s14, [#allocation4], %s465_s9, %s465_s9, %s466_s10  }
 0x250   :  { %462 = dma.done.wait [#allocation4], 256  }
 0x251   :  { %463 = vsyncadd [#allocation4], 4294967040 }
 0x252   :  { %296 = vsyncpa [#allocation3], 1 }
 0x253   :  { %297 = vsyncpa [#allocation6], 1 }
 0x254   :  { %298 = vsyncpa [#allocation9], 1 }
 0x255   :  { %299 = vsyncpa [#allocation4], 1 }

// kernel: tpu_custom_call.1
= control target key start
LH: loop header
LB: loop body
LE: loop exit
PB: predicated region body
PF: predicated region fallthrough
CT: control target
= control target key end

     0   :  { %12 = vsyncpa [#allocation3], 0  ;;  %s560_s0 = inlined_call_operand.hbm [shape: f32[16,128], index: 0, kind: input, shape index: {}]   ;;  %s561_s1 = inlined_call_operand.hbm [shape: f32[128,128], index: 1, kind: input, shape index: {}]   ;;  %s562_s2 = inlined_call_operand.hbm [shape: f32[128,128], index: 2, kind: input, shape index: {}]   ;;  %s563_s3 = inlined_call_operand.hbm [shape: f32[128,128], index: 3, kind: input, shape index: {}]   ;;  %s564_s4 = inlined_call_operand.hbm [shape: f32[128,128], index: 4, kind: input, shape index: {}]   ;;  %s565_s5 = inlined_call_operand.vmem [shape: f32[3,128], index: 5, kind: input, shape index: {}]   ;;  %s566_s6 = inlined_call_operand.vmem [shape: f32[1,128], index: 6, kind: input, shape index: {}]   ;;  %s567_s7 = inlined_call_operand.hbm [shape: f32[16,128], index: 7, kind: output, shape index: {}]  }
   0x1   :  { %13 = vsyncpa [#allocation6], 0 }
   0x2   :  { %14 = vsyncpa [#allocation9], 0 }
   0x3   :  { %15 = vsyncpa [#allocation4], 0  ;;  %s33_s26 = sshll.u32 %s561_s1, 4  ;;  %s464_s27 = smov [#allocation5]   ;;  %s34_s26 = int_to_ptr.hbm [resolvable:$true] %s33_s26 }
   0x4   :  { %s35_s28 = sshll.u32 %s464_s27, 4  ;;  %s59_s8 = sshll.u32 %s563_s3, 4  ;;  %s36_s28 = int_to_ptr.vmem [resolvable:$true] %s35_s28  ;;  %s60_s8 = int_to_ptr.hbm [resolvable:$true] %s59_s8 }
   0x5   :  { %s465_s9 = smov 128   ;;  %s466_s10 = smov 8  }
   0x6   :  { %41 = dma.hbm_to_vmem [thread:$0]  %s34_s26, 2048, %s36_s28, [#allocation6], %s465_s9, %s465_s9, %s466_s10  }
   0x7   :  { %s467_s11 = smov [#allocation8]   ;;  %s20_s1 = sshll.u32 %s560_s0, 4  ;;  %s21_s1 = int_to_ptr.hbm [resolvable:$true] %s20_s1 }
   0x8   :  { %s61_s12 = sshll.u32 %s467_s11, 4  ;;  %s46_s16 = sshll.u32 %s562_s2, 4  ;;  %s62_s12 = int_to_ptr.vmem [resolvable:$true] %s61_s12  ;;  %s47_s16 = int_to_ptr.hbm [resolvable:$true] %s46_s16 }
   0x9   :  { %67 = dma.hbm_to_vmem [thread:$0]  %s60_s8, 2048, %s62_s12, [#allocation9], %s465_s9, %s465_s9, %s466_s10  }
   0xa   :  { %s468_s17 = smov [#allocation2]   ;;  %s469_s19 = smov [#allocation7]  }
   0xb   :  { %s22_s18 = sshll.u32 %s468_s17, 4  ;;  %s48_s0 = sshll.u32 %s469_s19, 4  ;;  %s23_s18 = int_to_ptr.vmem [resolvable:$true] %s22_s18  ;;  %s49_s0 = int_to_ptr.vmem [resolvable:$true] %s48_s0 }
   0xc   :  { %28 = dma.hbm_to_vmem [thread:$0]  %s21_s1, 256, %s23_s18, [#allocation3], %s465_s9, %s465_s9, %s466_s10  }
   0xd   :  { %s72_s22 = sshll.u32 %s564_s4, 4  ;;  %s470_s2 = smov [#allocation10]   ;;  %s73_s22 = int_to_ptr.hbm [resolvable:$true] %s72_s22 }
   0xe   :  { %54 = dma.hbm_to_vmem [thread:$0]  %s47_s16, 2048, %s49_s0, [#allocation6], %s465_s9, %s465_s9, %s466_s10  }
   0xf   :  { %s74_s23 = sshll.u32 %s470_s2, 4  ;;  %s75_s23 = int_to_ptr.vmem [resolvable:$true] %s74_s23 }
  0x10   :  { %80 = dma.hbm_to_vmem [thread:$0]  %s73_s22, 2048, %s75_s23, [#allocation9], %s465_s9, %s465_s9, %s466_s10  }
  0x11   :  { %456 = dma.done.wait [#allocation3], 256  }
  0x12   :  { %457 = vsyncadd [#allocation3], 4294967040 }
  0x13   :  { %458 = dma.done.wait [#allocation6], 4096  }
  0x14   :  { %459 = vsyncadd [#allocation6], 4294963200 }
  0x15   :  { %460 = dma.done.wait [#allocation9], 4096  }
  0x16   :  { %461 = vsyncadd [#allocation9], 4294963200  ;;  %v122_v0 = vld [vmem:[#allocation5 + $0x78] sm:$0xff]  ;;  %v121_v1 = vld [vmem:[#allocation5 + $0x70] sm:$0xff]  ;;  %s471_s8 = smov [#allocation11]   ;;  %s285_s14 = sshll.u32 %s567_s7, 4  ;;  %s286_s14 = int_to_ptr.hbm [resolvable:$true] %s285_s14 }
  0x17   :  { %125 = vmatpush.msra.mxu0 %v122_v0  ;;  %v120_v2 = vld [vmem:[#allocation5 + $0x68] sm:$0xff]  ;;  %v119_v3 = vld [vmem:[#allocation5 + $0x60] sm:$0xff]  ;;  %v118_v4 = vld [vmem:[#allocation5 + $0x58] sm:$0xff]  ;;  %s283_s11 = sshll.u32 %s471_s8, 4  ;;  %s284_s11 = int_to_ptr.vmem [resolvable:$true] %s283_s11 }
  0x18   :  { %v117_v5 = vld [vmem:[#allocation5 + $0x50] sm:$0xff]  ;;  %v165_v6 = vld [vmem:[#allocation7 + $0x78] sm:$0xff]  ;;  %v116_v8 = vld [vmem:[#allocation5 + $0x48] sm:$0xff] }
  0x19   :  { %126 = vmatpush.msra.mxu0 %v121_v1  ;;  %v164_v7 = vld [vmem:[#allocation7 + $0x70] sm:$0xff]  ;;  %168 = vmatpush.msra.mxu1 %v165_v6  ;;  %v163_v9 = vld [vmem:[#allocation7 + $0x68] sm:$0xff]  ;;  %v115_v10 = vld [vmem:[#allocation5 + $0x40] sm:$0xff] }
  0x1a   :  { %v162_v11 = vld [vmem:[#allocation7 + $0x60] sm:$0xff]  ;;  %v114_v12 = vld [vmem:[#allocation5 + $0x38] sm:$0xff]  ;;  %v113_v14 = vld [vmem:[#allocation5 + $0x30] sm:$0xff] }
  0x1b   :  { %127 = vmatpush.msra.mxu0 %v120_v2  ;;  %169 = vmatpush.msra.mxu1 %v164_v7  ;;  %v161_v13 = vld [vmem:[#allocation7 + $0x58] sm:$0xff]  ;;  %v160_v15 = vld [vmem:[#allocation7 + $0x50] sm:$0xff]  ;;  %v112_v16 = vld [vmem:[#allocation5 + $0x28] sm:$0xff] }
  0x1c   :  { %v159_v17 = vld [vmem:[#allocation7 + $0x48] sm:$0xff]  ;;  %v111_v18 = vld [vmem:[#allocation5 + $0x20] sm:$0xff]  ;;  %v110_v20 = vld [vmem:[#allocation5 + $0x18] sm:$0xff] }
  0x1d   :  { %128 = vmatpush.msra.mxu0 %v119_v3  ;;  %170 = vmatpush.msra.mxu1 %v163_v9  ;;  %v158_v19 = vld [vmem:[#allocation7 + $0x40] sm:$0xff]  ;;  %v157_v21 = vld [vmem:[#allocation7 + $0x38] sm:$0xff]  ;;  %v109_v22 = vld [vmem:[#allocation5 + $0x10] sm:$0xff] }
  0x1e   :  { %v156_v23 = vld [vmem:[#allocation7 + $0x30] sm:$0xff]  ;;  %v108_v24 = vld [vmem:[#allocation5 + $0x8] sm:$0xff]  ;;  %v107_v26 = vld [vmem:[#allocation5] sm:$0xff] }
  0x1f   :  { %129 = vmatpush.msra.mxu0 %v118_v4  ;;  %171 = vmatpush.msra.mxu1 %v162_v11  ;;  %v155_v25 = vld [vmem:[#allocation7 + $0x28] sm:$0xff]  ;;  %v154_v27 = vld [vmem:[#allocation7 + $0x20] sm:$0xff]  ;;  %v105_v28 = vld [vmem:[#allocation2] sm:$0xff] }
  0x20   :  { %v153_v29 = vld [vmem:[#allocation7 + $0x18] sm:$0xff]  ;;  %v152_v31 = vld [vmem:[#allocation7 + $0x10] sm:$0xff]  ;;  %v151_v32 = vld [vmem:[#allocation7 + $0x8] sm:$0xff] }
  0x21   :  { %130 = vmatpush.msra.mxu0 %v117_v5  ;;  %172 = vmatpush.msra.mxu1 %v161_v13  ;;  %v106_v30 = vld [vmem:[#allocation2 + $0x8] sm:$0xff]  ;;  %v150_v33 = vld [vmem:[#allocation7] sm:$0xff]  ;;  %v207_v35 = vld [vmem:[#allocation8 + $0x70] sm:$0xff] }
  0x22   :  { %v208_v34 = vld [vmem:[#allocation8 + $0x78] sm:$0xff]  ;;  %v206_v36 = vld [vmem:[#allocation8 + $0x68] sm:$0xff]  ;;  %v205_v37 = vld [vmem:[#allocation8 + $0x60] sm:$0xff] }
  0x23   :  { %131 = vmatpush.msra.mxu0 %v116_v8  ;;  %173 = vmatpush.msra.mxu1 %v160_v15  ;;  %v204_v38 = vld [vmem:[#allocation8 + $0x58] sm:$0xff]  ;;  %v203_v39 = vld [vmem:[#allocation8 + $0x50] sm:$0xff]  ;;  %v202_v40 = vld [vmem:[#allocation8 + $0x48] sm:$0xff] }
  0x24   :  { %211 = vmatpush.msra.mxu2 %v208_v34  ;;  %v201_v41 = vld [vmem:[#allocation8 + $0x40] sm:$0xff]  ;;  %v200_v42 = vld [vmem:[#allocation8 + $0x38] sm:$0xff]  ;;  %v308_v43 = vld [vmem:[%s565_s5] ss:$0 sm:$0xff] }
  0x25   :  { %132 = vmatpush.msra.mxu0 %v115_v10  ;;  %174 = vmatpush.msra.mxu1 %v159_v17  ;;  %v199_v44 = vld [vmem:[#allocation8 + $0x30] sm:$0xff]  ;;  %v198_v45 = vld [vmem:[#allocation8 + $0x28] sm:$0xff]  ;;  %v197_v48 = vld [vmem:[#allocation8 + $0x20] sm:$0xff] }
  0x26   :  { %212 = vmatpush.msra.mxu2 %v207_v35  ;;  %v196_v50 = vld [vmem:[#allocation8 + $0x18] sm:$0xff]  ;;  %v195_v54 = vld [vmem:[#allocation8 + $0x10] sm:$0xff]  ;;  %v194_v55 = vld [vmem:[#allocation8 + $0x8] sm:$0xff] }
  0x27   :  { %133 = vmatpush.msra.mxu0 %v114_v12  ;;  %175 = vmatpush.msra.mxu1 %v158_v19  ;;  %v193_v56 = vld [vmem:[#allocation8] sm:$0xff]  ;;  %v249_v57 = vld [vmem:[#allocation10 + $0x78] sm:$0xff]  ;;  %v248_v58 = vld [vmem:[#allocation10 + $0x70] sm:$0xff] }
  0x28   :  { %213 = vmatpush.msra.mxu2 %v206_v36  ;;  %254 = vmatpush.msra.mxu3 %v249_v57  ;;  %v247_v59 = vld [vmem:[#allocation10 + $0x68] sm:$0xff]  ;;  %v246_v60 = vld [vmem:[#allocation10 + $0x60] sm:$0xff]  ;;  %v245_v61 = vld [vmem:[#allocation10 + $0x58] sm:$0xff] }
  0x29   :  { %134 = vmatpush.msra.mxu0 %v113_v14  ;;  %176 = vmatpush.msra.mxu1 %v157_v21  ;;  %v244_v62 = vld [vmem:[#allocation10 + $0x50] sm:$0xff]  ;;  %v243_v63 = vld [vmem:[#allocation10 + $0x48] sm:$0xff]  ;;  %v242_v0 = vld [vmem:[#allocation10 + $0x40] sm:$0xff] }
  0x2a   :  { %214 = vmatpush.msra.mxu2 %v205_v37  ;;  %255 = vmatpush.msra.mxu3 %v248_v58  ;;  %v241_v1 = vld [vmem:[#allocation10 + $0x38] sm:$0xff]  ;;  %v309_v2 = vld [vmem:[%s565_s5 + $0x1] ss:$0 sm:$0xff]  ;;  %v239_v4 = vld [vmem:[#allocation10 + $0x28] sm:$0xff] }
  0x2b   :  { %135 = vmatpush.msra.mxu0 %v112_v16  ;;  %177 = vmatpush.msra.mxu1 %v156_v23  ;;  %v240_v3 = vld [vmem:[#allocation10 + $0x30] sm:$0xff]  ;;  %v238_v7 = vld [vmem:[#allocation10 + $0x20] sm:$0xff]  ;;  %v237_v9 = vld [vmem:[#allocation10 + $0x18] sm:$0xff] }
  0x2c   :  { %215 = vmatpush.msra.mxu2 %v204_v38  ;;  %256 = vmatpush.msra.mxu3 %v247_v59  ;;  %v236_v10 = vld [vmem:[#allocation10 + $0x10] sm:$0xff]  ;;  %v235_v14 = vld [vmem:[#allocation10 + $0x8] sm:$0xff]  ;;  %v234_v15 = vld [vmem:[#allocation10] sm:$0xff] }
  0x2d   :  { %136 = vmatpush.msra.mxu0 %v111_v18  ;;  %178 = vmatpush.msra.mxu1 %v155_v25  ;;  %v310_v16 = vld [vmem:[%s565_s5 + $0x2] ss:$0 sm:$0xff]  ;;  %v311_v21 = vld [vmem:[%s566_s6] ss:$0 sm:$0xff] }
  0x2e   :  { %216 = vmatpush.msra.mxu2 %v203_v39  ;;  %257 = vmatpush.msra.mxu3 %v246_v60 }
  0x2f   :  { %137 = vmatpush.msra.mxu0 %v110_v20  ;;  %179 = vmatpush.msra.mxu1 %v154_v27 }
  0x30   :  { %217 = vmatpush.msra.mxu2 %v202_v40  ;;  %258 = vmatpush.msra.mxu3 %v245_v61 }
  0x31   :  { %138 = vmatpush.msra.mxu0 %v109_v22  ;;  %180 = vmatpush.msra.mxu1 %v153_v29 }
  0x32   :  { %218 = vmatpush.msra.mxu2 %v201_v41  ;;  %259 = vmatpush.msra.mxu3 %v244_v62 }
  0x33   :  { %139 = vmatpush.msra.mxu0 %v108_v24  ;;  %181 = vmatpush.msra.mxu1 %v152_v31 }
  0x34   :  { %219 = vmatpush.msra.mxu2 %v200_v42  ;;  %260 = vmatpush.msra.mxu3 %v243_v63 }
  0x35   :  { %140 = vmatpush.msra.mxu0 %v107_v26  ;;  %182 = vmatpush.msra.mxu1 %v151_v32 }
  0x36   :  { %141 = vmatmul.f32.vlgmr.msra.gmra.mxu0 %v105_v28  ;;  %220 = vmatpush.msra.mxu2 %v199_v44 }
  0x37   :  { %183 = vmatpush.msra.mxu1 %v150_v33  ;;  %261 = vmatpush.msra.mxu3 %v242_v0 }
  0x38   :  { %221 = vmatpush.msra.mxu2 %v198_v45 }
  0x39   :  { %262 = vmatpush.msra.mxu3 %v241_v1 }
  0x3a   :  { %222 = vmatpush.msra.mxu2 %v197_v48 }
  0x3b   :  { %263 = vmatpush.msra.mxu3 %v240_v3 }
  0x3c   :  { %223 = vmatpush.msra.mxu2 %v196_v50 }
  0x3d   :  { %264 = vmatpush.msra.mxu3 %v239_v4 }
  0x3e   :  { %144 = vmatmul.f32.gmra.mxu0 %v106_v30  ;;  %224 = vmatpush.msra.mxu2 %v195_v54 }
  0x3f   :  { %265 = vmatpush.msra.mxu3 %v238_v7 }
  0x40   :  { %225 = vmatpush.msra.mxu2 %v194_v55 }
  0x41   :  { %266 = vmatpush.msra.mxu3 %v237_v9 }
  0x42   :  { %226 = vmatpush.msra.mxu2 %v193_v56 }
  0x43   :  { %267 = vmatpush.msra.mxu3 %v236_v10 }
  0x45   :  { %268 = vmatpush.msra.mxu3 %v235_v14 }
  0x47   :  { %269 = vmatpush.msra.mxu3 %v234_v15 }
  0xb3   :  { %v142_v46 = vpop.f32.mrf.mxu0 }
  0xb4   :  { %v143_v47 = vadd.f32 %v308_v43, %v142_v46 }
  0xb6   :  { %v148_v49 = vmax.f32 %v143_v47, 0.0 }
  0xb8   :  { %184 = vmatmul.f32.vlgmr.msra.gmra.mxu1 %v148_v49 }
  0xbb   :  { %v145_v51 = vpop.f32.mrf.mxu0 }
  0xbc   :  { %v146_v52 = vadd.f32 %v308_v43, %v145_v51 }
  0xbe   :  { %v149_v53 = vmax.f32 %v146_v52, 0.0 }
  0xc0   :  { %187 = vmatmul.f32.gmra.mxu1 %v149_v53 }
 0x135   :  { %v185_v5 = vpop.f32.mrf.mxu1 }
 0x136   :  { %v186_v6 = vadd.f32 %v309_v2, %v185_v5 }
 0x138   :  { %v191_v8 = vmax.f32 %v186_v6, 0.0 }
 0x13a   :  { %227 = vmatmul.f32.vlgmr.msra.gmra.mxu2 %v191_v8 }
 0x13d   :  { %v188_v11 = vpop.f32.mrf.mxu1 }
 0x13e   :  { %v189_v12 = vadd.f32 %v309_v2, %v188_v11 }
 0x140   :  { %v192_v13 = vmax.f32 %v189_v12, 0.0 }
 0x142   :  { %230 = vmatmul.f32.gmra.mxu2 %v192_v13 }
 0x1bd   :  { %v228_v17 = vpop.f32.mrf.mxu2 }
 0x1be   :  { %v229_v18 = vadd.f32 %v310_v16, %v228_v17 }
 0x1c0   :  { %270 = vmatmul.f32.vlgmr.msra.gmra.mxu3 %v229_v18 }
 0x1c5   :  { %v231_v19 = vpop.f32.mrf.mxu2 }
 0x1c6   :  { %v232_v20 = vadd.f32 %v310_v16, %v231_v19 }
 0x1c8   :  { %273 = vmatmul.f32.gmra.mxu3 %v232_v20 }
 0x243   :  { %v271_v22 = vpop.f32.mrf.mxu3 }
 0x244   :  { %v272_v23 = vadd.f32 %v311_v21, %v271_v22 }
 0x246   :  { %277 = vst [vmem:[#allocation11] sm:$0xff] %v272_v23 }
 0x24b   :  { %v274_v24 = vpop.f32.mrf.mxu3 }
 0x24c   :  { %v275_v25 = vadd.f32 %v311_v21, %v274_v24 }
 0x24e   :  { %278 = vst [vmem:[#allocation11 + $0x8] sm:$0xff] %v275_v25 }
 0x24f   :  { %291 = dma.vmem_to_hbm [thread:$0]  %s284_s11, 256, %s286_s14, [#allocation4], %s465_s9, %s465_s9, %s466_s10  }
 0x250   :  { %462 = dma.done.wait [#allocation4], 256  }
 0x251   :  { %463 = vsyncadd [#allocation4], 4294967040 }
 0x252   :  { %296 = vsyncpa [#allocation3], 1 }
 0x253   :  { %297 = vsyncpa [#allocation6], 1 }
 0x254   :  { %298 = vsyncpa [#allocation9], 1 }
 0x255   :  { %299 = vsyncpa [#allocation4], 1 }

</bundles_post_ra>
